<compile_context>
chip_gen: v7x
topology: tpu7x:2x2x1
jax: 0.10.0
libtpu: 0.0.40
codegen_flags: <defaults>
</compile_context>

<pallas_src>
import jax
import jax.numpy as jnp
from jax.experimental import pallas as pl
from jax.experimental.pallas import tpu as pltpu

LANE = 128      # lane width (last dim granularity)
SUBLANE = 8     # sublane height (second-to-last dim granularity)
HIDDEN = 256


def _round_up(v, m):
    return ((v + m - 1) // m) * m


def _pick_batch_tile(batch, *, max_tile=2048, single_tile_max=256):
    """Batch tiling policy.

    * tiny batches (<= 256 rows): one tile covering the 8-aligned batch
      (splitting only adds the ~0.35us/step fixed grid overhead).
    * larger batches: at least 2 equal-sized tiles (so the "parallel" batch
      axis can shard over v7x's two TensorCores), each tile <= max_tile rows
      and a multiple of 8, chosen so B_p stays within 8 rows of B (avoids
      paying DMA/MXU for big zero-row pads when B is just past a boundary).
    """
    b8 = _round_up(batch, SUBLANE)
    if b8 <= single_tile_max:
        return b8
    steps = max(2, pl.cdiv(b8, max_tile))
    return _round_up(pl.cdiv(batch, steps), SUBLANE)


# ---------------------------------------------------------------------------
# Kernel body: 4 MXU matmuls (f32 accumulation) + 3 VPU ReLUs, fully fused.
# Shared by the single-net and fused online+target paths (refs are identical
# shapes after the dual path squeezes its leading net axis).
# ---------------------------------------------------------------------------
def qnet_kernel(x_ref, w1_ref, b1_ref, w2_ref, b2_ref,
                w3_ref, b3_ref, w4_ref, b4_ref, o_ref):
    # Layer 1: x @ W1 -> f32 accumulate on MXU, f32 bias, ReLU (VPU).
    h = jnp.dot(x_ref[...], w1_ref[...], preferred_element_type=jnp.float32)
    h = jnp.maximum(h + b1_ref[...], 0.0)
    # Layers 2/3: cast activations back to the weight dtype for the MXU,
    # keep f32 accumulation.
    h = jnp.dot(h.astype(w2_ref.dtype), w2_ref[...],
                preferred_element_type=jnp.float32)
    h = jnp.maximum(h + b2_ref[...], 0.0)
    h = jnp.dot(h.astype(w3_ref.dtype), w3_ref[...],
                preferred_element_type=jnp.float32)
    h = jnp.maximum(h + b3_ref[...], 0.0)
    # Output layer (columns lane-padded to 128 -> unmasked, lane-dense stores).
    out = jnp.dot(h.astype(w4_ref.dtype), w4_ref[...],
                  preferred_element_type=jnp.float32)
    o_ref[...] = (out + b4_ref[...]).astype(o_ref.dtype)


# ---------------------------------------------------------------------------
# One-time parameter preparation (hoisted out of the per-call path).
# ---------------------------------------------------------------------------
def prepare_params(params, *, compute_dtype=jnp.bfloat16):
    """Cast weights to the MXU compute dtype, keep biases f32, and lane-pad
    only the output layer (n_actions -> 128).  Input features are NOT padded.
    Returns a dict of device arrays plus the real n_actions."""
    hidden = params["w1"].shape[1]
    n_actions = params["w4"].shape[1]
    n_out_p = _round_up(n_actions, LANE)

    w4 = jnp.zeros((hidden, n_out_p), compute_dtype)
    w4 = w4.at[:, :n_actions].set(params["w4"].astype(compute_dtype))
    b4 = jnp.zeros((1, n_out_p), jnp.float32)
    b4 = b4.at[:, :n_actions].set(
        params["b4"].astype(jnp.float32).reshape(1, -1))

    return {
        "w1": params["w1"].astype(compute_dtype),
        "b1": params["b1"].astype(jnp.float32).reshape(1, -1),
        "w2": params["w2"].astype(compute_dtype),
        "b2": params["b2"].astype(jnp.float32).reshape(1, -1),
        "w3": params["w3"].astype(compute_dtype),
        "b3": params["b3"].astype(jnp.float32).reshape(1, -1),
        "w4": w4,
        "b4": b4,
        "n_actions": n_actions,
    }


def prepare_params_dual(params_a, params_b, *, compute_dtype=jnp.bfloat16):
    """Prepare + stack two weight sets (online, target) along a leading axis
    for the fused dual-net evaluation.  Done once, not per call."""
    pa = prepare_params(params_a, compute_dtype=compute_dtype)
    pb = prepare_params(params_b, compute_dtype=compute_dtype)
    keys = ("w1", "b1", "w2", "b2", "w3", "b3", "w4", "b4")
    prep = {k: jnp.stack([pa[k], pb[k]]) for k in keys}
    prep["n_actions"] = pa["n_actions"]
    return prep


# ---------------------------------------------------------------------------
# Forward wrappers.
# ---------------------------------------------------------------------------
def qnet_forward(x, prep, *, batch_tile=None, out_dtype=None):
    """x: (B, input_dims) f32/bf16.  prep: output of prepare_params()."""
    B, d_in = x.shape
    w1, b1 = prep["w1"], prep["b1"]
    w2, b2 = prep["w2"], prep["b2"]
    w3, b3 = prep["w3"], prep["b3"]
    w4, b4 = prep["w4"], prep["b4"]
    n_actions = prep["n_actions"]
    hidden = w1.shape[1]
    n_out_p = w4.shape[1]
    cdt = w1.dtype
    if out_dtype is None:
        # bf16 Q-values are fine for argmax action selection; pass
        # out_dtype=jnp.float32 if TD-target accumulation demands it.
        out_dtype = cdt
    assert d_in == w1.shape[0], "x feature dim must match w1"

    if batch_tile is None:
        batch_tile = _pick_batch_tile(B)
    assert batch_tile % SUBLANE == 0, (
        "batch_tile must be a multiple of 8 ((8,128) sublane tiling rule)")
    B_p = _round_up(B, batch_tile)

    # Per-call work is now just a cast (and a tiny batch-row pad if needed).
    x_c = x.astype(cdt)
    if B_p != B:
        x_c = jnp.pad(x_c, ((0, B_p - B), (0, 0)))

    grid = (B_p // batch_tile,)

    # Weights/biases: constant block index -> resident in VMEM across the grid.
    def const_spec(shape):
        return pl.BlockSpec(shape, lambda i: (0,) * len(shape))

    flops = 2 * B_p * (d_in * hidden + 2 * hidden * hidden + hidden * n_out_p)
    bytes_accessed = int(
        x_c.size * x_c.dtype.itemsize
        + sum(a.size * a.dtype.itemsize
              for a in (w1, w2, w3, w4, b1, b2, b3, b4))
        + B_p * n_out_p * jnp.dtype(out_dtype).itemsize)

    out = pl.pallas_call(
        qnet_kernel,
        out_shape=jax.ShapeDtypeStruct((B_p, n_out_p), out_dtype),
        grid_spec=pltpu.PrefetchScalarGridSpec(
            num_scalar_prefetch=0,
            grid=grid,
            in_specs=[
                # x kept at its real feature width (last block dim == full dim).
                pl.BlockSpec((batch_tile, d_in), lambda i: (i, 0)),
                const_spec(w1.shape), const_spec(b1.shape),
                const_spec(w2.shape), const_spec(b2.shape),
                const_spec(w3.shape), const_spec(b3.shape),
                const_spec(w4.shape), const_spec(b4.shape),
            ],
            out_specs=pl.BlockSpec((batch_tile, n_out_p), lambda i: (i, 0)),
        ),
        compiler_params=pltpu.CompilerParams(
            dimension_semantics=("parallel",)),
        cost_estimate=pl.CostEstimate(
            flops=flops, transcendentals=0, bytes_accessed=bytes_accessed),
    )(x_c, w1, b1, w2, b2, w3, b3, w4, b4)

    # TODO(synk): further wins for the B~8 path: keep weights resident across
    # calls via cross-call VMEM prefetch (P10), and a feature-major
    # (transposed) formulation to shrink the output DMA 32x at large batch.
    return out[:B, :n_actions]


def qnet_forward_dual(x, prep_dual, *, batch_tile=None, out_dtype=None):
    """Fused online+target evaluation on the same batch in ONE pallas_call.
    prep_dual: output of prepare_params_dual().  Returns (2, B, n_actions)."""
    B, d_in = x.shape
    w1, b1 = prep_dual["w1"], prep_dual["b1"]
    w2, b2 = prep_dual["w2"], prep_dual["b2"]
    w3, b3 = prep_dual["w3"], prep_dual["b3"]
    w4, b4 = prep_dual["w4"], prep_dual["b4"]
    n_actions = prep_dual["n_actions"]
    n_nets = w1.shape[0]
    hidden = w1.shape[2]
    n_out_p = w4.shape[2]
    cdt = w1.dtype
    if out_dtype is None:
        out_dtype = cdt
    assert d_in == w1.shape[1]

    if batch_tile is None:
        batch_tile = _pick_batch_tile(B)
    assert batch_tile % SUBLANE == 0
    B_p = _round_up(B, batch_tile)

    x_c = x.astype(cdt)
    if B_p != B:
        x_c = jnp.pad(x_c, ((0, B_p - B), (0, 0)))

    grid = (n_nets, B_p // batch_tile)

    # Per-net weight/bias block: leading net axis squeezed out so the kernel
    # body is identical to the single-net one.
    def net_spec(arr):
        nd = arr.ndim
        return pl.BlockSpec((None,) + arr.shape[1:],
                            lambda n, i: (n,) + (0,) * (nd - 1))

    flops = 2 * n_nets * B_p * (
        d_in * hidden + 2 * hidden * hidden + hidden * n_out_p)
    bytes_accessed = int(
        x_c.size * x_c.dtype.itemsize
        + sum(a.size * a.dtype.itemsize
              for a in (w1, w2, w3, w4, b1, b2, b3, b4))
        + n_nets * B_p * n_out_p * jnp.dtype(out_dtype).itemsize)

    out = pl.pallas_call(
        qnet_kernel,
        out_shape=jax.ShapeDtypeStruct((n_nets, B_p, n_out_p), out_dtype),
        grid_spec=pltpu.PrefetchScalarGridSpec(
            num_scalar_prefetch=0,
            grid=grid,
            in_specs=[
                pl.BlockSpec((batch_tile, d_in), lambda n, i: (i, 0)),
                net_spec(w1), net_spec(b1),
                net_spec(w2), net_spec(b2),
                net_spec(w3), net_spec(b3),
                net_spec(w4), net_spec(b4),
            ],
            out_specs=pl.BlockSpec((None, batch_tile, n_out_p),
                                   lambda n, i: (n, i, 0)),
        ),
        compiler_params=pltpu.CompilerParams(
            dimension_semantics=("parallel", "parallel")),
        cost_estimate=pl.CostEstimate(
            flops=flops, transcendentals=0, bytes_accessed=bytes_accessed),
    )(x_c, w1, b1, w2, b2, w3, b3, w4, b4)

    return out[:, :B, :n_actions]


# ---------------------------------------------------------------------------
# Init + pure-JAX reference.
# ---------------------------------------------------------------------------
def init_params(key, input_dims, n_actions, hidden=HIDDEN):
    """Mimics torch.nn.Linear default init (uniform +-1/sqrt(fan_in)).
    Weights stored as (in, out) = torch weight transposed; biases (1, out)."""
    dims = [(input_dims, hidden), (hidden, hidden),
            (hidden, hidden), (hidden, n_actions)]
    params = {}
    for idx, (fan_in, fan_out) in enumerate(dims, start=1):
        key, kw, kb = jax.random.split(key, 3)
        bound = 1.0 / jnp.sqrt(jnp.float32(fan_in))
        params[f"w{idx}"] = jax.random.uniform(
            kw, (fan_in, fan_out), jnp.float32, -bound, bound)
        params[f"b{idx}"] = jax.random.uniform(
            kb, (1, fan_out), jnp.float32, -bound, bound)
    return params


def qnet_reference(x, p, dtype=jnp.float32):
    """Pure-JAX reference. With dtype=bf16 it applies the same input/weight
    quantization as the bf16 kernel path (f32 accumulation, HIGHEST precision)."""
    def lin(h, w, b):
        hq = h.astype(dtype).astype(jnp.float32)
        wq = w.astype(dtype).astype(jnp.float32)
        return jnp.dot(hq, wq, precision=jax.lax.Precision.HIGHEST) + b
    h = jnp.maximum(lin(x, p["w1"], p["b1"]), 0.0)
    h = jnp.maximum(lin(h, p["w2"], p["b2"]), 0.0)
    h = jnp.maximum(lin(h, p["w3"], p["b3"]), 0.0)
    return lin(h, p["w4"], p["b4"])


if __name__ == "__main__":
    key = jax.random.PRNGKey(0)
    batch, input_dims, n_actions = 8, 16, 4

    kx, kp1, kp2 = jax.random.split(key, 3)
    x = jax.random.normal(kx, (batch, input_dims), jnp.float32)
    params_online = init_params(kp1, input_dims, n_actions)
    params_target = init_params(kp2, input_dims, n_actions)

    # Default production path: bf16 weights/activations/output, f32 accumulation.
    prep_bf16 = prepare_params(params_online)              # one-time prep
    out_bf16 = jax.block_until_ready(qnet_forward(x, prep_bf16))
    assert out_bf16.shape == (batch, n_actions)
    ref_bf16 = qnet_reference(x, params_online, dtype=jnp.bfloat16)
    assert jnp.allclose(out_bf16.astype(jnp.float32), ref_bf16,
                        atol=2e-2, rtol=2e-2)

    # Full-f32 path matches the torch-f32 reference tightly.
    prep_f32 = prepare_params(params_online, compute_dtype=jnp.float32)
    out_f32 = jax.block_until_ready(
        qnet_forward(x, prep_f32, out_dtype=jnp.float32))
    ref_f32 = qnet_reference(x, params_online, dtype=jnp.float32)
    assert jnp.allclose(out_f32, ref_f32, atol=1e-4, rtol=1e-4)

    # Fused online+target evaluation (one launch, shared x DMA).
    prep_dual = prepare_params_dual(params_online, params_target)
    out_dual = jax.block_until_ready(qnet_forward_dual(x, prep_dual))
    assert out_dual.shape == (2, batch, n_actions)
    ref_tgt = qnet_reference(x, params_target, dtype=jnp.bfloat16)
    assert jnp.allclose(out_dual[0].astype(jnp.float32), ref_bf16,
                        atol=2e-2, rtol=2e-2)
    assert jnp.allclose(out_dual[1].astype(jnp.float32), ref_tgt,
                        atol=2e-2, rtol=2e-2)

    print("KERNEL_OK")
</pallas_src>

<mosaic_0001>
module attributes {stable_mosaic.version = 11 : i64} {
  func.func @qnet_kernel(%arg0: i32, %arg1: memref<8x16xbf16, #tpu.memory_space<vmem>>, %arg2: memref<16x256xbf16, #tpu.memory_space<vmem>>, %arg3: memref<1x256xf32, #tpu.memory_space<vmem>>, %arg4: memref<256x256xbf16, #tpu.memory_space<vmem>>, %arg5: memref<1x256xf32, #tpu.memory_space<vmem>>, %arg6: memref<256x256xbf16, #tpu.memory_space<vmem>>, %arg7: memref<1x256xf32, #tpu.memory_space<vmem>>, %arg8: memref<256x128xbf16, #tpu.memory_space<vmem>>, %arg9: memref<1x128xf32, #tpu.memory_space<vmem>>, %arg10: memref<8x128xbf16, #tpu.memory_space<vmem>>) attributes {dimension_semantics = [#tpu.dimension_semantics<parallel>], iteration_bounds = array<i64: 1>, scalar_prefetch = 0 : i64, scratch_operands = 0 : i64, tpu.core_type = #tpu.core_type<tc>, window_params = [{transform_indices = @transform_0, window_bounds = array<i64: 8, 16>}, {pipeline_mode = #tpu.pipeline_mode<synchronous>, transform_indices = @transform_1, window_bounds = array<i64: 16, 256>}, {pipeline_mode = #tpu.pipeline_mode<synchronous>, transform_indices = @transform_2, window_bounds = array<i64: 1, 256>}, {pipeline_mode = #tpu.pipeline_mode<synchronous>, transform_indices = @transform_3, window_bounds = array<i64: 256, 256>}, {pipeline_mode = #tpu.pipeline_mode<synchronous>, transform_indices = @transform_4, window_bounds = array<i64: 1, 256>}, {pipeline_mode = #tpu.pipeline_mode<synchronous>, transform_indices = @transform_5, window_bounds = array<i64: 256, 256>}, {pipeline_mode = #tpu.pipeline_mode<synchronous>, transform_indices = @transform_6, window_bounds = array<i64: 1, 256>}, {pipeline_mode = #tpu.pipeline_mode<synchronous>, transform_indices = @transform_7, window_bounds = array<i64: 256, 128>}, {pipeline_mode = #tpu.pipeline_mode<synchronous>, transform_indices = @transform_8, window_bounds = array<i64: 1, 128>}, {transform_indices = @transform_9, window_bounds = array<i64: 8, 128>}]} {
    %c0 = arith.constant 0 : index
    %c0_0 = arith.constant 0 : index
    %0 = vector.load %arg1[%c0, %c0_0] : memref<8x16xbf16, #tpu.memory_space<vmem>>, vector<8x16xbf16>
    %c0_1 = arith.constant 0 : index
    %c0_2 = arith.constant 0 : index
    %1 = vector.load %arg2[%c0_1, %c0_2] : memref<16x256xbf16, #tpu.memory_space<vmem>>, vector<16x256xbf16>
    %cst = arith.constant dense<0.000000e+00> : vector<8x256xf32>
    %2 = tpu.matmul %0, %1, %cst {dimension_numbers = #tpu.dot_dimension_numbers<[1], [0], [0], [1], [0, 0, 1, 1], [], []>} : vector<8x16xbf16>, vector<16x256xbf16>, vector<8x256xf32> -> vector<8x256xf32>
    %c0_3 = arith.constant 0 : index
    %c0_4 = arith.constant 0 : index
    %3 = vector.load %arg3[%c0_3, %c0_4] : memref<1x256xf32, #tpu.memory_space<vmem>>, vector<1x256xf32>
    %4 = vector.broadcast %3 : vector<1x256xf32> to vector<8x256xf32>
    %5 = arith.addf %2, %4 : vector<8x256xf32>
    %cst_5 = arith.constant 0.000000e+00 : f32
    %6 = vector.broadcast %cst_5 : f32 to vector<8x256xf32>
    %7 = arith.maximumf %5, %6 : vector<8x256xf32>
    %8 = arith.truncf %7 : vector<8x256xf32> to vector<8x256xbf16>
    %c0_6 = arith.constant 0 : index
    %c0_7 = arith.constant 0 : index
    %9 = vector.load %arg4[%c0_6, %c0_7] : memref<256x256xbf16, #tpu.memory_space<vmem>>, vector<256x256xbf16>
    %cst_8 = arith.constant dense<0.000000e+00> : vector<8x256xf32>
    %10 = tpu.matmul %8, %9, %cst_8 {dimension_numbers = #tpu.dot_dimension_numbers<[1], [0], [0], [1], [0, 0, 1, 1], [], []>} : vector<8x256xbf16>, vector<256x256xbf16>, vector<8x256xf32> -> vector<8x256xf32>
    %c0_9 = arith.constant 0 : index
    %c0_10 = arith.constant 0 : index
    %11 = vector.load %arg5[%c0_9, %c0_10] : memref<1x256xf32, #tpu.memory_space<vmem>>, vector<1x256xf32>
    %12 = vector.broadcast %11 : vector<1x256xf32> to vector<8x256xf32>
    %13 = arith.addf %10, %12 : vector<8x256xf32>
    %cst_11 = arith.constant 0.000000e+00 : f32
    %14 = vector.broadcast %cst_11 : f32 to vector<8x256xf32>
    %15 = arith.maximumf %13, %14 : vector<8x256xf32>
    %16 = arith.truncf %15 : vector<8x256xf32> to vector<8x256xbf16>
    %c0_12 = arith.constant 0 : index
    %c0_13 = arith.constant 0 : index
    %17 = vector.load %arg6[%c0_12, %c0_13] : memref<256x256xbf16, #tpu.memory_space<vmem>>, vector<256x256xbf16>
    %cst_14 = arith.constant dense<0.000000e+00> : vector<8x256xf32>
    %18 = tpu.matmul %16, %17, %cst_14 {dimension_numbers = #tpu.dot_dimension_numbers<[1], [0], [0], [1], [0, 0, 1, 1], [], []>} : vector<8x256xbf16>, vector<256x256xbf16>, vector<8x256xf32> -> vector<8x256xf32>
    %c0_15 = arith.constant 0 : index
    %c0_16 = arith.constant 0 : index
    %19 = vector.load %arg7[%c0_15, %c0_16] : memref<1x256xf32, #tpu.memory_space<vmem>>, vector<1x256xf32>
    %20 = vector.broadcast %19 : vector<1x256xf32> to vector<8x256xf32>
    %21 = arith.addf %18, %20 : vector<8x256xf32>
    %cst_17 = arith.constant 0.000000e+00 : f32
    %22 = vector.broadcast %cst_17 : f32 to vector<8x256xf32>
    %23 = arith.maximumf %21, %22 : vector<8x256xf32>
    %24 = arith.truncf %23 : vector<8x256xf32> to vector<8x256xbf16>
    %c0_18 = arith.constant 0 : index
    %c0_19 = arith.constant 0 : index
    %25 = vector.load %arg8[%c0_18, %c0_19] : memref<256x128xbf16, #tpu.memory_space<vmem>>, vector<256x128xbf16>
    %cst_20 = arith.constant dense<0.000000e+00> : vector<8x128xf32>
    %26 = tpu.matmul %24, %25, %cst_20 {dimension_numbers = #tpu.dot_dimension_numbers<[1], [0], [0], [1], [0, 0, 1, 1], [], []>} : vector<8x256xbf16>, vector<256x128xbf16>, vector<8x128xf32> -> vector<8x128xf32>
    %c0_21 = arith.constant 0 : index
    %c0_22 = arith.constant 0 : index
    %27 = vector.load %arg9[%c0_21, %c0_22] : memref<1x128xf32, #tpu.memory_space<vmem>>, vector<1x128xf32>
    %28 = vector.broadcast %27 : vector<1x128xf32> to vector<8x128xf32>
    %29 = arith.addf %26, %28 : vector<8x128xf32>
    %30 = arith.truncf %29 : vector<8x128xf32> to vector<8x128xbf16>
    %c0_23 = arith.constant 0 : index
    %c0_24 = arith.constant 0 : index
    %31 = vector.load %arg10[%c0_23, %c0_24] : memref<8x128xbf16, #tpu.memory_space<vmem>>, vector<8x128xbf16>
    tpu.vector_store %arg10[%c0_23, %c0_24], %30 {strides = array<i32>} : memref<8x128xbf16, #tpu.memory_space<vmem>>, vector<8x128xbf16>,
    return
  }
  func.func @transform_0(%arg0: i32) -> (i32, i32) {
    %c0_i32 = arith.constant 0 : i32
    %c0_i32_0 = arith.constant 0 : i32
    return %arg0, %c0_i32 : i32, i32
  }
  func.func @transform_1(%arg0: i32) -> (i32, i32) {
    %c0_i32 = arith.constant 0 : i32
    %c0_i32_0 = arith.constant 0 : i32
    %c0_i32_1 = arith.constant 0 : i32
    return %c0_i32, %c0_i32_0 : i32, i32
  }
  func.func @transform_2(%arg0: i32) -> (i32, i32) {
    %c0_i32 = arith.constant 0 : i32
    %c0_i32_0 = arith.constant 0 : i32
    %c0_i32_1 = arith.constant 0 : i32
    return %c0_i32, %c0_i32_0 : i32, i32
  }
  func.func @transform_3(%arg0: i32) -> (i32, i32) {
    %c0_i32 = arith.constant 0 : i32
    %c0_i32_0 = arith.constant 0 : i32
    %c0_i32_1 = arith.constant 0 : i32
    return %c0_i32, %c0_i32_0 : i32, i32
  }
  func.func @transform_4(%arg0: i32) -> (i32, i32) {
    %c0_i32 = arith.constant 0 : i32
    %c0_i32_0 = arith.constant 0 : i32
    %c0_i32_1 = arith.constant 0 : i32
    return %c0_i32, %c0_i32_0 : i32, i32
  }
  func.func @transform_5(%arg0: i32) -> (i32, i32) {
    %c0_i32 = arith.constant 0 : i32
    %c0_i32_0 = arith.constant 0 : i32
    %c0_i32_1 = arith.constant 0 : i32
    return %c0_i32, %c0_i32_0 : i32, i32
  }
  func.func @transform_6(%arg0: i32) -> (i32, i32) {
    %c0_i32 = arith.constant 0 : i32
    %c0_i32_0 = arith.constant 0 : i32
    %c0_i32_1 = arith.constant 0 : i32
    return %c0_i32, %c0_i32_0 : i32, i32
  }
  func.func @transform_7(%arg0: i32) -> (i32, i32) {
    %c0_i32 = arith.constant 0 : i32
    %c0_i32_0 = arith.constant 0 : i32
    %c0_i32_1 = arith.constant 0 : i32
    return %c0_i32, %c0_i32_0 : i32, i32
  }
  func.func @transform_8(%arg0: i32) -> (i32, i32) {
    %c0_i32 = arith.constant 0 : i32
    %c0_i32_0 = arith.constant 0 : i32
    %c0_i32_1 = arith.constant 0 : i32
    return %c0_i32, %c0_i32_0 : i32, i32
  }
  func.func @transform_9(%arg0: i32) -> (i32, i32) {
    %c0_i32 = arith.constant 0 : i32
    %c0_i32_0 = arith.constant 0 : i32
    return %arg0, %c0_i32 : i32, i32
  }
}

</mosaic_0001>

<bundles_post_ra>
// kernel: tpu_custom_call.1
= control target key start
LH: loop header
LB: loop body
LE: loop exit
PB: predicated region body
PF: predicated region fallthrough
CT: control target
= control target key end

     0   :  { %14 = vsyncpa [#allocation3], 0  ;;  %s1402_s0 = inlined_call_operand.hbm [shape: bf16[8,16], index: 0, kind: input, shape index: {}]   ;;  %s1403_s1 = inlined_call_operand.hbm [shape: bf16[16,256], index: 1, kind: input, shape index: {}]   ;;  %s1404_s2 = inlined_call_operand.vmem [shape: f32[1,256], index: 2, kind: input, shape index: {}]   ;;  %s1405_s3 = inlined_call_operand.hbm [shape: bf16[256,256], index: 3, kind: input, shape index: {}]   ;;  %s1406_s4 = inlined_call_operand.vmem [shape: f32[1,256], index: 4, kind: input, shape index: {}]   ;;  %s1407_s5 = inlined_call_operand.hbm [shape: bf16[256,256], index: 5, kind: input, shape index: {}]   ;;  %s1408_s6 = inlined_call_operand.vmem [shape: f32[1,256], index: 6, kind: input, shape index: {}]   ;;  %s1409_s7 = inlined_call_operand.hbm [shape: bf16[256,128], index: 7, kind: input, shape index: {}]   ;;  %s1410_s8 = inlined_call_operand.vmem [shape: f32[1,128], index: 8, kind: input, shape index: {}]   ;;  %s1411_s9 = inlined_call_operand.hbm [shape: bf16[8,128], index: 9, kind: output, shape index: {}]  }
   0x1   :  { %15 = vsyncpa [#allocation6], 0 }
   0x2   :  { %16 = vsyncpa [#allocation9], 0 }
   0x3   :  { %17 = vsyncpa [#allocation4], 0  ;;  %s1238_s30 = smov [#allocation5]   ;;  %s1098_s13 = scalar_lea.hbm %s1403_s1, 256 }
   0x4   :  { %s33_s10 = sshll.u32 %s1238_s30, 4  ;;  %p1099_p0 = scmp.ne.s32.totalorder %s1403_s1, %s1098_s13  ;;  %s34_s10 = int_to_ptr.vmem [resolvable:$true] %s33_s10 }
   0x5   :  { %p1102_p1 = scmp.lt.u32.totalorder %s1098_s13, %s1403_s1 }
   0x7   :  { %p1104_p2 = pnand %p1102_p1, %p1099_p0 }
   0x9   :  { %1107 = shalt.err (!%p1104_p2)
}
   0xa   :  { %s1108_s18 = scalar_lea.vmem %s34_s10, 256  ;;  %p1113_p4 = scmp.lt.s32.totalorder %s34_s10, %s34_s10 }
   0xb   :  { %p1109_p3 = scmp.ne.s32.totalorder %s34_s10, %s1108_s18  ;;  %p1114_p5 = scmp.lt.s32.totalorder %s1108_s18, %s1108_s18 }
   0xd   :  { %p1115_p6 = por %p1114_p5, %p1113_p4 }
   0xf   :  { %p1116_p7 = pnand %p1115_p6, %p1109_p3 }
  0x11   :  { %1119 = shalt.err (!%p1116_p7)
}
  0x12   :  { %s1239_s19 = smov 128   ;;  %s1240_s20 = smov 8  }
  0x13   :  { %39 = dma.hbm_to_vmem [thread:$0]  %s1403_s1, 256, %s34_s10, [#allocation6], %s1239_s19, %s1239_s19, %s1240_s20  }
  0x14   :  { %s1241_s23 = smov [#allocation8]   ;;  %s1242_s25 = smov [#allocation2]  }
  0x15   :  { %s61_s24 = sshll.u32 %s1241_s23, 4  ;;  %s24_s26 = sshll.u32 %s1242_s25, 4  ;;  %s62_s24 = int_to_ptr.vmem [resolvable:$true] %s61_s24  ;;  %s25_s26 = int_to_ptr.vmem [resolvable:$true] %s24_s26 }
  0x16   :  { %s1120_s29 = scalar_lea.hbm %s1407_s5, 4096 }
  0x17   :  { %p1121_p8 = scmp.ne.s32.totalorder %s1407_s5, %s1120_s29  ;;  %p1124_p9 = scmp.lt.u32.totalorder %s1120_s29, %s1407_s5 }
  0x19   :  { %p1126_p10 = pnand %p1124_p9, %p1121_p8 }
  0x1b   :  { %1129 = shalt.err (!%p1126_p10)
}
  0x1c   :  { %s1130_s1 = scalar_lea.vmem %s62_s24, 4096  ;;  %p1135_p12 = scmp.lt.s32.totalorder %s62_s24, %s62_s24 }
  0x1d   :  { %p1131_p11 = scmp.ne.s32.totalorder %s62_s24, %s1130_s1  ;;  %p1136_p13 = scmp.lt.s32.totalorder %s1130_s1, %s1130_s1 }
  0x1f   :  { %p1137_p0 = por %p1136_p13, %p1135_p12 }
  0x21   :  { %p1138_p1 = pnand %p1137_p0, %p1131_p11 }
  0x23   :  { %1141 = shalt.err (!%p1138_p1)
}
  0x24   :  { %67 = dma.hbm_to_vmem [thread:$0]  %s1407_s5, 4096, %s62_s24, [#allocation9], %s1239_s19, %s1239_s19, %s1240_s20  }
  0x25   :  { %s1142_s17 = scalar_lea.hbm %s1402_s0, 64 }
  0x26   :  { %p1143_p2 = scmp.ne.s32.totalorder %s1402_s0, %s1142_s17  ;;  %p1146_p3 = scmp.lt.u32.totalorder %s1142_s17, %s1402_s0 }
  0x28   :  { %p1148_p4 = pnand %p1146_p3, %p1143_p2 }
  0x2a   :  { %1151 = shalt.err (!%p1148_p4)
}
  0x2b   :  { %s1152_s25 = scalar_lea.vmem %s25_s26, 64  ;;  %p1157_p6 = scmp.lt.s32.totalorder %s25_s26, %s25_s26 }
  0x2c   :  { %p1153_p5 = scmp.ne.s32.totalorder %s25_s26, %s1152_s25  ;;  %p1158_p7 = scmp.lt.s32.totalorder %s1152_s25, %s1152_s25 }
  0x2e   :  { %p1159_p8 = por %p1158_p7, %p1157_p6 }
  0x30   :  { %p1160_p9 = pnand %p1159_p8, %p1153_p5 }
  0x32   :  { %1163 = shalt.err (!%p1160_p9)
}
  0x33   :  { %27 = dma.hbm_to_vmem [thread:$0]  %s1402_s0, 64, %s25_s26, [#allocation3]  }
  0x34   :  { %s1243_s27 = smov [#allocation7]   ;;  %s1244_s29 = smov [#allocation10]  }
  0x35   :  { %s47_s28 = sshll.u32 %s1243_s27, 4  ;;  %s75_s30 = sshll.u32 %s1244_s29, 4  ;;  %s48_s28 = int_to_ptr.vmem [resolvable:$true] %s47_s28  ;;  %s76_s30 = int_to_ptr.vmem [resolvable:$true] %s75_s30 }
  0x36   :  { %s1164_s13 = scalar_lea.hbm %s1405_s3, 4096 }
  0x37   :  { %p1165_p10 = scmp.ne.s32.totalorder %s1405_s3, %s1164_s13  ;;  %p1168_p11 = scmp.lt.u32.totalorder %s1164_s13, %s1405_s3 }
  0x39   :  { %p1170_p12 = pnand %p1168_p11, %p1165_p10 }
  0x3b   :  { %1173 = shalt.err (!%p1170_p12)
}
  0x3c   :  { %s1174_s0 = scalar_lea.vmem %s48_s28, 4096  ;;  %p1179_p0 = scmp.lt.s32.totalorder %s48_s28, %s48_s28 }
  0x3d   :  { %p1175_p13 = scmp.ne.s32.totalorder %s48_s28, %s1174_s0  ;;  %p1180_p1 = scmp.lt.s32.totalorder %s1174_s0, %s1174_s0 }
  0x3f   :  { %p1181_p2 = por %p1180_p1, %p1179_p0 }
  0x41   :  { %p1182_p3 = pnand %p1181_p2, %p1175_p13 }
  0x43   :  { %1185 = shalt.err (!%p1182_p3)
}
  0x44   :  { %53 = dma.hbm_to_vmem [thread:$0]  %s1405_s3, 4096, %s48_s28, [#allocation6], %s1239_s19, %s1239_s19, %s1240_s20  }
  0x45   :  { %s1186_s21 = scalar_lea.hbm %s1409_s7, 2048 }
  0x46   :  { %p1187_p4 = scmp.ne.s32.totalorder %s1409_s7, %s1186_s21  ;;  %p1190_p5 = scmp.lt.u32.totalorder %s1186_s21, %s1409_s7 }
  0x48   :  { %p1192_p6 = pnand %p1190_p5, %p1187_p4 }
  0x4a   :  { %1195 = shalt.err (!%p1192_p6)
}
  0x4b   :  { %s1196_s24 = scalar_lea.vmem %s76_s30, 2048  ;;  %p1201_p8 = scmp.lt.s32.totalorder %s76_s30, %s76_s30 }
  0x4c   :  { %p1197_p7 = scmp.ne.s32.totalorder %s76_s30, %s1196_s24  ;;  %p1202_p9 = scmp.lt.s32.totalorder %s1196_s24, %s1196_s24 }
  0x4e   :  { %p1203_p10 = por %p1202_p9, %p1201_p8 }
  0x50   :  { %p1204_p11 = pnand %p1203_p10, %p1197_p7 }
  0x52   :  { %1207 = shalt.err (!%p1204_p11)
}
  0x53   :  { %s1245_s3 = smov 64   ;;  %s1246_s19 = smov 4  }
  0x54   :  { %81 = dma.hbm_to_vmem [thread:$0]  %s1409_s7, 2048, %s76_s30, [#allocation9], %s1245_s3, %s1245_s3, %s1246_s19  }
  0x55   :  { %1230 = dma.done.wait [#allocation3], 64  }
  0x56   :  { %1231 = vsyncadd [#allocation3], 4294967232 }
  0x57   :  { %1232 = dma.done.wait [#allocation6], 4352  }
  0x58   :  { %1233 = vsyncadd [#allocation6], 4294962944 }
  0x59   :  { %1234 = dma.done.wait [#allocation9], 6144  }
  0x5a   :  { %1235 = vsyncadd [#allocation9], 4294961152  ;;  %v1247_v0 = vmov 0   ;;  %v983_v1 = vld [vmem:[#allocation5 + $0x4] ss:$8 sps:$4 sm:$0xff]   ;;  %vm125_vm0 = vcmask 130048  }
  0x5b   :  { %161 = vmatprep.mubr.bf16.mxu0 %v1247_v0  ;;  %v985_v2 = vld [vmem:[#allocation5] ss:$8 sps:$4 sm:$0xff]   ;;  %v100_v3 = vld [vmem:[#allocation2] sm:$0xf]  ;;  %129 = vmatprep.subr.bf16.mxu0 %v983_v1  ;;  %v988_v5 = vld [vmem:[#allocation7] ss:$8 sps:$4 sm:$0xff]   ;;  %v105_v0 = vlaneseq }
  0x5c   :  { %v986_v4 = vld [vmem:[#allocation7 + $0x4] ss:$8 sps:$4 sm:$0xff]   ;;  %130 = vmatpush1.bf16.msra.mxu0 %v985_v2  ;;  %v989_v6 = vld [vmem:[#allocation7 + $0x14] ss:$8 sps:$4 sm:$0xff]   ;;  %v991_v7 = vld [vmem:[#allocation7 + $0x10] ss:$8 sps:$4 sm:$0xff]  }
  0x5d   :  { %378 = vmatprep.subr.bf16.mxu1 %v986_v4  ;;  %v992_v8 = vld [vmem:[#allocation7 + $0x24] ss:$8 sps:$4 sm:$0xff]   ;;  %v994_v9 = vld [vmem:[#allocation7 + $0x20] ss:$8 sps:$4 sm:$0xff]   ;;  %v995_v10 = vld [vmem:[#allocation7 + $0x34] ss:$8 sps:$4 sm:$0xff]  }
  0x5e   :  { %379 = vmatpush1.bf16.msra.mxu1 %v988_v5  ;;  %v997_v11 = vld [vmem:[#allocation7 + $0x30] ss:$8 sps:$4 sm:$0xff]   ;;  %v998_v12 = vld [vmem:[#allocation7 + $0x44] ss:$8 sps:$4 sm:$0xff]   ;;  %v1000_v13 = vld [vmem:[#allocation7 + $0x40] ss:$8 sps:$4 sm:$0xff]  }
  0x5f   :  { %868 = vmatmul.mubr.msk.bf16.vlgmr.msra.gmra.mrb[0].mxu0 %vm125_vm0, %v100_v3  ;;  %380 = vmatprep.subr.bf16.mxu1 %v989_v6  ;;  %v1001_v14 = vld [vmem:[#allocation7 + $0x54] ss:$8 sps:$4 sm:$0xff]   ;;  %v1003_v15 = vld [vmem:[#allocation7 + $0x50] ss:$8 sps:$4 sm:$0xff]   ;;  %v1004_v16 = vld [vmem:[#allocation7 + $0x64] ss:$8 sps:$4 sm:$0xff]  }
  0x60   :  { %v1006_v17 = vld [vmem:[#allocation7 + $0x60] ss:$8 sps:$4 sm:$0xff]   ;;  %v1007_v18 = vld [vmem:[#allocation7 + $0x74] ss:$8 sps:$4 sm:$0xff]   ;;  %v1009_v19 = vld [vmem:[#allocation7 + $0x70] ss:$8 sps:$4 sm:$0xff]  }
  0x61   :  { %v1010_v20 = vld [vmem:[#allocation7 + $0x84] ss:$8 sps:$4 sm:$0xff]   ;;  %v1012_v21 = vld [vmem:[#allocation7 + $0x80] ss:$8 sps:$4 sm:$0xff]   ;;  %v1013_v22 = vld [vmem:[#allocation7 + $0x94] ss:$8 sps:$4 sm:$0xff]  }
  0x62   :  { %381 = vmatpush1.bf16.msra.mxu1 %v991_v7  ;;  %v1015_v23 = vld [vmem:[#allocation7 + $0x90] ss:$8 sps:$4 sm:$0xff]   ;;  %v1016_v24 = vld [vmem:[#allocation7 + $0xa4] ss:$8 sps:$4 sm:$0xff]   ;;  %v1018_v25 = vld [vmem:[#allocation7 + $0xa0] ss:$8 sps:$4 sm:$0xff]  }
  0x63   :  { %382 = vmatprep.subr.bf16.mxu1 %v992_v8  ;;  %v1019_v26 = vld [vmem:[#allocation7 + $0xb4] ss:$8 sps:$4 sm:$0xff]   ;;  %v1021_v27 = vld [vmem:[#allocation7 + $0xb0] ss:$8 sps:$4 sm:$0xff]   ;;  %v1022_v28 = vld [vmem:[#allocation7 + $0xc4] ss:$8 sps:$4 sm:$0xff]  }
  0x64   :  { %v1024_v29 = vld [vmem:[#allocation7 + $0xc0] ss:$8 sps:$4 sm:$0xff]   ;;  %v1025_v30 = vld [vmem:[#allocation7 + $0xd4] ss:$8 sps:$4 sm:$0xff]   ;;  %v1027_v31 = vld [vmem:[#allocation7 + $0xd0] ss:$8 sps:$4 sm:$0xff]  }
  0x65   :  { %v1028_v32 = vld [vmem:[#allocation7 + $0xe4] ss:$8 sps:$4 sm:$0xff]   ;;  %v1030_v33 = vld [vmem:[#allocation7 + $0xe0] ss:$8 sps:$4 sm:$0xff]   ;;  %v1031_v34 = vld [vmem:[#allocation7 + $0xf4] ss:$8 sps:$4 sm:$0xff]  }
  0x66   :  { %383 = vmatpush1.bf16.msra.mxu1 %v994_v9  ;;  %v1033_v35 = vld [vmem:[#allocation7 + $0xf0] ss:$8 sps:$4 sm:$0xff]   ;;  %v1034_v36 = vld [vmem:[#allocation8] ss:$8 sps:$4 sm:$0xff]   ;;  %v1036_v37 = vld [vmem:[#allocation8 + $0x4] ss:$8 sps:$4 sm:$0xff]  }
  0x67   :  { %384 = vmatprep.subr.bf16.mxu1 %v995_v10  ;;  %v1039_v38 = vld [vmem:[#allocation8 + $0x14] ss:$8 sps:$4 sm:$0xff]   ;;  %627 = vmatprep.subr.bf16.mxu0 %v1036_v37  ;;  %v1037_v39 = vld [vmem:[#allocation8 + $0x10] ss:$8 sps:$4 sm:$0xff]   ;;  %v1042_v40 = vld [vmem:[#allocation8 + $0x24] ss:$8 sps:$4 sm:$0xff]  }
  0x68   :  { %628 = vmatpush1.bf16.msra.mxu0 %v1034_v36  ;;  %v1040_v41 = vld [vmem:[#allocation8 + $0x20] ss:$8 sps:$4 sm:$0xff]   ;;  %v1045_v42 = vld [vmem:[#allocation8 + $0x34] ss:$8 sps:$4 sm:$0xff]   ;;  %v1043_v43 = vld [vmem:[#allocation8 + $0x30] ss:$8 sps:$4 sm:$0xff]  }
  0x69   :  { %629 = vmatprep.subr.bf16.mxu0 %v1039_v38  ;;  %v1048_v44 = vld [vmem:[#allocation8 + $0x44] ss:$8 sps:$4 sm:$0xff]   ;;  %v1046_v45 = vld [vmem:[#allocation8 + $0x40] ss:$8 sps:$4 sm:$0xff]   ;;  %v1051_v46 = vld [vmem:[#allocation8 + $0x54] ss:$8 sps:$4 sm:$0xff]  }
  0x6a   :  { %385 = vmatpush1.bf16.msra.mxu1 %v997_v11  ;;  %v1049_v47 = vld [vmem:[#allocation8 + $0x50] ss:$8 sps:$4 sm:$0xff]   ;;  %v1054_v48 = vld [vmem:[#allocation8 + $0x64] ss:$8 sps:$4 sm:$0xff]   ;;  %v1052_v49 = vld [vmem:[#allocation8 + $0x60] ss:$8 sps:$4 sm:$0xff]  }
  0x6b   :  { %386 = vmatprep.subr.bf16.mxu1 %v998_v12  ;;  %v1057_v50 = vld [vmem:[#allocation8 + $0x74] ss:$8 sps:$4 sm:$0xff]   ;;  %v1055_v51 = vld [vmem:[#allocation8 + $0x70] ss:$8 sps:$4 sm:$0xff]   ;;  %v1060_v52 = vld [vmem:[#allocation8 + $0x84] ss:$8 sps:$4 sm:$0xff]  }
  0x6c   :  { %630 = vmatpush1.bf16.msra.mxu0 %v1037_v39  ;;  %v1058_v53 = vld [vmem:[#allocation8 + $0x80] ss:$8 sps:$4 sm:$0xff]   ;;  %v1063_v54 = vld [vmem:[#allocation8 + $0x94] ss:$8 sps:$4 sm:$0xff]   ;;  %v1061_v55 = vld [vmem:[#allocation8 + $0x90] ss:$8 sps:$4 sm:$0xff]  }
  0x6d   :  { %631 = vmatprep.subr.bf16.mxu0 %v1042_v40  ;;  %v1066_v56 = vld [vmem:[#allocation8 + $0xa4] ss:$8 sps:$4 sm:$0xff]   ;;  %v1064_v57 = vld [vmem:[#allocation8 + $0xa0] ss:$8 sps:$4 sm:$0xff]   ;;  %v1069_v58 = vld [vmem:[#allocation8 + $0xb4] ss:$8 sps:$4 sm:$0xff]  }
  0x6e   :  { %387 = vmatpush1.bf16.msra.mxu1 %v1000_v13  ;;  %v1067_v59 = vld [vmem:[#allocation8 + $0xb0] ss:$8 sps:$4 sm:$0xff]   ;;  %v1072_v60 = vld [vmem:[#allocation8 + $0xc4] ss:$8 sps:$4 sm:$0xff]   ;;  %v1070_v61 = vld [vmem:[#allocation8 + $0xc0] ss:$8 sps:$4 sm:$0xff]  }
  0x6f   :  { %388 = vmatprep.subr.bf16.mxu1 %v1001_v14  ;;  %v1075_v62 = vld [vmem:[#allocation8 + $0xd4] ss:$8 sps:$4 sm:$0xff]   ;;  %v1073_v63 = vld [vmem:[#allocation8 + $0xd0] ss:$8 sps:$4 sm:$0xff]   ;;  %v106_v1 = vshrl.u32 %v105_v0, 7 }
  0x70   :  { %632 = vmatpush1.bf16.msra.mxu0 %v1040_v41  ;;  %v103_v3 = vld [vmem:[%s1404_s2] sm:$0x3] }
  0x71   :  { %633 = vmatprep.subr.bf16.mxu0 %v1045_v42  ;;  %v1368_v2 = vsub.s32 0, %v106_v1  ;;  %v1373_v4 = vsub.s32 1, %v106_v1  ;;  %v933_v0 = vld [vmem:[%s1410_s8] ss:$0 sm:$0xff] }
  0x72   :  { %389 = vmatpush1.bf16.msra.mxu1 %v1003_v15 }
  0x73   :  { %390 = vmatprep.subr.bf16.mxu1 %v1004_v16  ;;  %v108_v5 = vrot.slane %v103_v3, %v1368_v2  ;;  %v112_v6 = vrot.slane %v103_v3, %v1373_v4 }
  0x74   :  { %634 = vmatpush1.bf16.msra.mxu0 %v1043_v43 }
  0x75   :  { %635 = vmatprep.subr.bf16.mxu0 %v1048_v44 }
  0x76   :  { %391 = vmatpush1.bf16.msra.mxu1 %v1006_v17  ;;  %v1078_v17 = vld [vmem:[#allocation8 + $0xe4] ss:$8 sps:$4 sm:$0xff]  }
  0x77   :  { %392 = vmatprep.subr.bf16.mxu1 %v1007_v18  ;;  %v1076_v18 = vld [vmem:[#allocation8 + $0xe0] ss:$8 sps:$4 sm:$0xff]  }
  0x78   :  { %636 = vmatpush1.bf16.msra.mxu0 %v1046_v45 }
  0x79   :  { %637 = vmatprep.subr.bf16.mxu0 %v1051_v46  ;;  %v1094_v46 = vld [vmem:[#allocation10 + $0x70] sm:$0xff]  }
  0x7a   :  { %393 = vmatpush1.bf16.msra.mxu1 %v1009_v19  ;;  %v1081_v19 = vld [vmem:[#allocation8 + $0xf4] ss:$8 sps:$4 sm:$0xff]  }
  0x7b   :  { %394 = vmatprep.subr.bf16.mxu1 %v1010_v20  ;;  %v1079_v20 = vld [vmem:[#allocation8 + $0xf0] ss:$8 sps:$4 sm:$0xff]  }
  0x7c   :  { %638 = vmatpush1.bf16.msra.mxu0 %v1049_v47  ;;  %v1095_v47 = vld [vmem:[#allocation10 + $0x30] sm:$0xff]  }
  0x7d   :  { %639 = vmatprep.subr.bf16.mxu0 %v1054_v48  ;;  %v1096_v48 = vld [vmem:[#allocation10 + $0x78] sm:$0xff]  }
  0x7e   :  { %395 = vmatpush1.bf16.msra.mxu1 %v1012_v21  ;;  %v1082_v21 = vld [vmem:[#allocation10 + $0x40] sm:$0xff]  }
  0x7f   :  { %396 = vmatprep.subr.bf16.mxu1 %v1013_v22  ;;  %v1083_v22 = vld [vmem:[#allocation10] sm:$0xff]  }
  0x80   :  { %640 = vmatpush1.bf16.msra.mxu0 %v1052_v49  ;;  %v1097_v49 = vld [vmem:[#allocation10 + $0x38] sm:$0xff]  }
  0x81   :  { %641 = vmatprep.subr.bf16.mxu0 %v1057_v50  ;;  %v455_v50 = vld [vmem:[%s1408_s6] sm:$0x3]  ;;  %s1248_s6 = smov [#allocation11]  }
  0x82   :  { %397 = vmatpush1.bf16.msra.mxu1 %v1015_v23  ;;  %v1084_v23 = vld [vmem:[#allocation10 + $0x48] sm:$0xff]   ;;  %s855_s13 = sshll.u32 %s1248_s6, 4  ;;  %s856_s13 = int_to_ptr.vmem [resolvable:$true] %s855_s13 }
  0x83   :  { %398 = vmatprep.subr.bf16.mxu1 %v1016_v24  ;;  %v1085_v24 = vld [vmem:[#allocation10 + $0x8] sm:$0xff]   ;;  %s1208_s1 = scalar_lea.vmem %s856_s13, 64  ;;  %p1213_p13 = scmp.lt.s32.totalorder %s856_s13, %s856_s13 }
  0x84   :  { %642 = vmatpush1.bf16.msra.mxu0 %v1055_v51  ;;  %v460_v51 = vrot.slane %v455_v50, %v1368_v2  ;;  %p1209_p12 = scmp.ne.s32.totalorder %s856_s13, %s1208_s1  ;;  %p1214_p0 = scmp.lt.s32.totalorder %s1208_s1, %s1208_s1 }
  0x85   :  { %643 = vmatprep.subr.bf16.mxu0 %v1060_v52  ;;  %v464_v52 = vrot.slane %v455_v50, %v1373_v4 }
  0x86   :  { %399 = vmatpush1.bf16.msra.mxu1 %v1018_v25  ;;  %v1086_v25 = vld [vmem:[#allocation10 + $0x50] sm:$0xff]   ;;  %p1215_p1 = por %p1214_p0, %p1213_p13 }
  0x87   :  { %400 = vmatprep.subr.bf16.mxu1 %v1019_v26  ;;  %v1087_v26 = vld [vmem:[#allocation10 + $0x10] sm:$0xff]  }
  0x88   :  { %644 = vmatpush1.bf16.msra.mxu0 %v1058_v53  ;;  %p1216_p2 = pnand %p1215_p1, %p1209_p12 }
  0x89   :  { %645 = vmatprep.subr.bf16.mxu0 %v1063_v54 }
  0x8a   :  { %401 = vmatpush1.bf16.msra.mxu1 %v1021_v27  ;;  %v1088_v27 = vld [vmem:[#allocation10 + $0x58] sm:$0xff]  }
  0x8b   :  { %402 = vmatprep.subr.bf16.mxu1 %v1022_v28  ;;  %v1089_v28 = vld [vmem:[#allocation10 + $0x18] sm:$0xff]  }
  0x8c   :  { %646 = vmatpush1.bf16.msra.mxu0 %v1061_v55 }
  0x8d   :  { %647 = vmatprep.subr.bf16.mxu0 %v1066_v56 }
  0x8e   :  { %403 = vmatpush1.bf16.msra.mxu1 %v1024_v29  ;;  %v1090_v29 = vld [vmem:[#allocation10 + $0x60] sm:$0xff]  }
  0x8f   :  { %404 = vmatprep.subr.bf16.mxu1 %v1025_v30  ;;  %v1091_v30 = vld [vmem:[#allocation10 + $0x20] sm:$0xff]  }
  0x90   :  { %648 = vmatpush1.bf16.msra.mxu0 %v1064_v57 }
  0x91   :  { %649 = vmatprep.subr.bf16.mxu0 %v1069_v58 }
  0x92   :  { %405 = vmatpush1.bf16.msra.mxu1 %v1027_v31  ;;  %v1092_v31 = vld [vmem:[#allocation10 + $0x68] sm:$0xff]  }
  0x93   :  { %406 = vmatprep.subr.bf16.mxu1 %v1028_v32  ;;  %v1093_v32 = vld [vmem:[#allocation10 + $0x28] sm:$0xff]  }
  0x94   :  { %650 = vmatpush1.bf16.msra.mxu0 %v1067_v59 }
  0x95   :  { %651 = vmatprep.subr.bf16.mxu0 %v1072_v60 }
  0x96   :  { %407 = vmatpush1.bf16.msra.mxu1 %v1030_v33  ;;  %v206_v33 = vld [vmem:[%s1406_s4] sm:$0x3] }
  0x97   :  { %408 = vmatprep.subr.bf16.mxu1 %v1031_v34  ;;  %v211_v34 = vrot.slane %v206_v33, %v1368_v2 }
  0x98   :  { %652 = vmatpush1.bf16.msra.mxu0 %v1070_v61 }
  0x99   :  { %653 = vmatprep.subr.bf16.mxu0 %v1075_v62 }
  0x9a   :  { %409 = vmatpush1.bf16.msra.mxu1 %v1033_v35  ;;  %v215_v35 = vrot.slane %v206_v33, %v1373_v4 }
  0x9b   :  { %950 = vmatprep.subr.bf16.mxu1 %v1082_v21 }
  0x9c   :  { %654 = vmatpush1.bf16.msra.mxu0 %v1073_v63 }
  0x9d   :  { %655 = vmatprep.subr.bf16.mxu0 %v1078_v17 }
  0xa0   :  { %656 = vmatpush1.bf16.msra.mxu0 %v1076_v18 }
  0xa1   :  { %657 = vmatprep.subr.bf16.mxu0 %v1081_v19 }
  0xa4   :  { %658 = vmatpush1.bf16.msra.mxu0 %v1079_v20 }
 0x132   :  { %v163_v7 = vpop.f32.mrb[0].mxu0 }
 0x133   :  { %v164_v8 = vadd.f32 %v163_v7, %v108_v5  ;;  %v165_v9 = vpop.f32.mrb[1].mxu0 }
 0x134   :  { %v166_v10 = vadd.f32 %v165_v9, %v112_v6  ;;  %v167_v11 = vpop.f32.mrb[2].mxu0 }
 0x135   :  { %v170_v12 = vmax.f32 %v164_v8, 0.0  ;;  %v168_v13 = vpop.f32.mrb[3].mxu0 }
 0x136   :  { %v171_v14 = vmax.f32 %v166_v10, 0.0 }
 0x137   :  { %v172_v16 = vpack.c.bf16 %v170_v12, %v170_v12 }
 0x138   :  { %v173_v15 = vpack.c.bf16 %v171_v14, %v171_v14 }
 0x13a   :  { %410 = vmatprep.mubr.bf16.mxu1 %v173_v15 }
 0x13b   :  { %411 = vmatmul.mubr.bf16.vlgmr.msra.gmra.mrb[0].mxu1 %v172_v16 }
 0x13c   :  { %951 = vmatpush3.bf16.msra.mxu1 %v1083_v22 }
 0x13d   :  { %952 = vmatprep.subr.bf16.mxu1 %v1084_v23 }
 0x140   :  { %953 = vmatpush3.bf16.msra.mxu1 %v1085_v24 }
 0x141   :  { %954 = vmatprep.subr.bf16.mxu1 %v1086_v25 }
 0x144   :  { %955 = vmatpush3.bf16.msra.mxu1 %v1087_v26 }
 0x145   :  { %956 = vmatprep.subr.bf16.mxu1 %v1088_v27 }
 0x148   :  { %957 = vmatpush3.bf16.msra.mxu1 %v1089_v28 }
 0x149   :  { %958 = vmatprep.subr.bf16.mxu1 %v1090_v29 }
 0x14c   :  { %959 = vmatpush3.bf16.msra.mxu1 %v1091_v30 }
 0x14d   :  { %960 = vmatprep.subr.bf16.mxu1 %v1092_v31 }
 0x150   :  { %961 = vmatpush3.bf16.msra.mxu1 %v1093_v32 }
 0x151   :  { %962 = vmatprep.subr.bf16.mxu1 %v1094_v46 }
 0x154   :  { %963 = vmatpush3.bf16.msra.mxu1 %v1095_v47 }
 0x155   :  { %964 = vmatprep.subr.bf16.mxu1 %v1096_v48 }
 0x158   :  { %965 = vmatpush3.bf16.msra.mxu1 %v1097_v49 }
 0x20e   :  { %v412_v36 = vpop.f32.mrb[0].mxu1 }
 0x20f   :  { %v413_v37 = vadd.f32 %v412_v36, %v211_v34  ;;  %v414_v38 = vpop.f32.mrb[1].mxu1 }
 0x210   :  { %v415_v39 = vadd.f32 %v414_v38, %v215_v35  ;;  %v416_v40 = vpop.f32.mrb[2].mxu1 }
 0x211   :  { %v419_v41 = vmax.f32 %v413_v37, 0.0  ;;  %v417_v42 = vpop.f32.mrb[3].mxu1 }
 0x212   :  { %v420_v43 = vmax.f32 %v415_v39, 0.0 }
 0x213   :  { %v421_v45 = vpack.c.bf16 %v419_v41, %v419_v41 }
 0x214   :  { %v422_v44 = vpack.c.bf16 %v420_v43, %v420_v43 }
 0x216   :  { %659 = vmatprep.mubr.bf16.mxu0 %v422_v44 }
 0x217   :  { %660 = vmatmul.mubr.bf16.vlgmr.msra.gmra.mrb[4].mxu0 %v421_v45 }
 0x2ea   :  { %v661_v53 = vpop.f32.mrb[4].mxu0 }
 0x2eb   :  { %v662_v54 = vadd.f32 %v661_v53, %v460_v51  ;;  %v663_v55 = vpop.f32.mrb[5].mxu0 }
 0x2ec   :  { %v664_v56 = vadd.f32 %v663_v55, %v464_v52  ;;  %v665_v57 = vpop.f32.mrb[6].mxu0 }
 0x2ed   :  { %v668_v58 = vmax.f32 %v662_v54, 0.0  ;;  %v666_v59 = vpop.f32.mrb[7].mxu0 }
 0x2ee   :  { %v669_v60 = vmax.f32 %v664_v56, 0.0 }
 0x2ef   :  { %v670_v62 = vpack.c.bf16 %v668_v58, %v668_v58 }
 0x2f0   :  { %v671_v61 = vpack.c.bf16 %v669_v60, %v669_v60 }
 0x2f2   :  { %839 = vmatprep.mubr.bf16.mxu1 %v671_v61 }
 0x2f3   :  { %840 = vmatmul.mubr.bf16.vlgmr.msra.gmra.mrb[4].mxu1 %v670_v62 }
 0x3c6   :  { %v966_v63 = vpop.f32.mrb[4].mxu1 }
 0x3c7   :  { %v967_v1 = vpop.f32.mrb[5].mxu1 }
 0x3c8   :  { %v968_v2 = vadd.f32 %v967_v1, %v966_v63  ;;  %v969_v3 = vpop.f32.mrb[6].mxu1 }
 0x3c9   :  { %v970_v4 = vpop.f32.mrb[7].mxu1 }
 0x3ca   :  { %v842_v5 = vadd.f32 %v968_v2, %v933_v0 }
 0x3cc   :  { %v847_v6 = vpack.c.bf16 %v842_v5, %v842_v5 }
 0x3ce   :  { %848 = vst [vmem:[#allocation11] sm:$0xf] %v847_v6 }
 0x3cf   :  { %1219 = shalt.err (!%p1216_p2)
}
 0x3d0   :  { %s1220_s8 = scalar_lea.hbm %s1411_s9, 64 }
 0x3d1   :  { %p1221_p3 = scmp.ne.s32.totalorder %s1411_s9, %s1220_s8  ;;  %p1224_p4 = scmp.lt.u32.totalorder %s1220_s8, %s1411_s9 }
 0x3d3   :  { %p1226_p5 = pnand %p1224_p4, %p1221_p3 }
 0x3d5   :  { %1229 = shalt.err (!%p1226_p5)
}
 0x3d6   :  { %858 = dma.vmem_to_hbm [thread:$0]  %s856_s13, 64, %s1411_s9, [#allocation4]  }
 0x3d7   :  { %1236 = dma.done.wait [#allocation4], 64  }
 0x3d8   :  { %1237 = vsyncadd [#allocation4], 4294967232 }
 0x3d9   :  { %862 = vsyncpa [#allocation3], 1 }
 0x3da   :  { %863 = vsyncpa [#allocation6], 1 }
 0x3db   :  { %864 = vsyncpa [#allocation9], 1 }
 0x3dc   :  { %865 = vsyncpa [#allocation4], 1 }

</bundles_post_ra>
